<compile_context>
chip_gen: v6e
topology: v6e:2x2x1
jax: 0.10.0
libtpu: 0.0.40
codegen_flags: <defaults>
</compile_context>

<pallas_src>
import numpy as np
import jax
import jax.numpy as jnp
from jax.experimental import pallas as pl
from jax.experimental.pallas import tpu as pltpu

LANES = 128
SUBLANES = 8


def _round_up(n, m):
    return (n + m - 1) // m * m


# ------------------------------- fused kernel --------------------------------

def _sage_net_kernel(x0_ref, adj0_ref, w1_ref, b1_ref,
                     adj1_ref, w2_ref, b2_ref, out_ref):
    f32 = jnp.float32
    bf16 = jnp.bfloat16

    # ---- layer 1: mean aggregation + linear + bias + ReLU --------------------
    adj0 = adj0_ref[...]                                        # [D0p, S0]
    x0 = x0_ref[...]                                            # [S0, F_in]
    agg0 = jnp.dot(adj0.astype(bf16), x0.astype(bf16),
                   preferred_element_type=f32)                  # [D0p, F_in]
    deg0 = jnp.sum(adj0, axis=1, keepdims=True)                 # [D0p, 1]
    agg0 = agg0 * pl.reciprocal(jnp.maximum(deg0, 1.0), approx=True)
    h1 = jnp.dot(agg0.astype(bf16), w1_ref[...].astype(bf16),
                 preferred_element_type=f32) + b1_ref[...]      # [D0p, 64]
    h1 = jnp.maximum(h1, 0.0)                                   # ReLU
    # TODO(synk): F.dropout(p=args.dropout) only applies in training; eval mode
    # is the identity, so it is intentionally omitted here.

    # ---- layer 2: mean aggregation + linear + bias ---------------------------
    adj1 = adj1_ref[...]                                        # [D1p, D0p]
    agg1 = jnp.dot(adj1.astype(bf16), h1.astype(bf16),
                   preferred_element_type=f32)                  # [D1p, 64]
    deg1 = jnp.sum(adj1, axis=1, keepdims=True)
    agg1 = agg1 * pl.reciprocal(jnp.maximum(deg1, 1.0), approx=True)
    logits = jnp.dot(agg1.astype(bf16), w2_ref[...].astype(bf16),
                     preferred_element_type=f32) + b2_ref[...]  # [D1p, 128]

    # ---- log_softmax over the 128 padded lanes: padded columns carry a -1e30
    # bias and zero weights, so exp() underflows to 0 and the result matches the
    # log_softmax over the real out_channels columns (kept in f32).
    m = jnp.max(logits, axis=1, keepdims=True)
    z = logits - m
    lse = jnp.log(jnp.sum(jnp.exp(z), axis=1, keepdims=True))
    out_ref[...] = (z - lse).astype(out_ref.dtype)


def sage_net_forward(x_src0, adj0, w1, b1, adj1, w2, b2,
                     *, n_dst_final, out_channels):
    """Fused 2-layer SAGENet forward. adj0/adj1 must be row/col padded and
    w2/b2 lane-padded (see pad_* helpers). Returns [n_dst_final, out_channels]."""
    vmem = pl.BlockSpec(memory_space=pltpu.MemorySpace.VMEM)
    padded_out = pl.pallas_call(
        _sage_net_kernel,
        out_shape=jax.ShapeDtypeStruct((adj1.shape[0], w2.shape[1]), jnp.float32),
        in_specs=[vmem] * 7,
        out_specs=vmem,
    )(x_src0, adj0, w1, b1, adj1, w2, b2)
    return padded_out[:n_dst_final, :out_channels]


# --------------------------- parameter / data glue ----------------------------

def init_sage_params(key, in_ch, out_ch):
    scale = 1.0 / np.sqrt(in_ch)
    w = jax.random.uniform(key, (in_ch, out_ch), jnp.float32, -scale, scale)
    b = jnp.zeros((1, out_ch), jnp.float32)
    return w, b


def pad_output_params(w, b, lanes=LANES):
    """Pad the last layer's weight/bias to `lanes` output columns: zero weights
    and -1e30 bias for padded columns so the in-kernel 128-lane log_softmax is
    exact over the real columns."""
    in_ch, out_ch = w.shape
    w_pad = jnp.zeros((in_ch, lanes), jnp.float32).at[:, :out_ch].set(w)
    b_pad = jnp.full((1, lanes), -1e30, jnp.float32).at[:, :out_ch].set(b)
    return w_pad, b_pad


def make_block(rng, pool_size, n_src, n_dst, avg_deg):
    """Synthetic NeighborSampler block: n_id + edge_index -> dense 0/1 adjacency
    adj[n_dst, n_src] (every target gets >= 1 in-edge)."""
    n_id = rng.choice(pool_size, size=n_src, replace=False).astype(np.int32)
    adj = np.zeros((n_dst, n_src), np.float32)
    for t in range(n_dst):
        adj[t, rng.integers(0, n_src)] = 1.0
        for _ in range(avg_deg):
            adj[t, rng.integers(0, n_src)] = 1.0
    return n_id, adj


def pad_adj(adj, row_mult=SUBLANES, col_to=None):
    rows = _round_up(adj.shape[0], row_mult)
    cols = adj.shape[1] if col_to is None else col_to
    out = np.zeros((rows, cols), np.float32)
    out[:adj.shape[0], :adj.shape[1]] = adj
    return jnp.asarray(out)


def sage_net_reference(x_src0, adj0, w1, b1, adj1, w2, b2):
    """Pure-JAX f32 reference of the same forward pass (unpadded)."""
    deg0 = jnp.maximum(adj0.sum(axis=1, keepdims=True), 1.0)
    h1 = jax.nn.relu((adj0 @ x_src0) / deg0 @ w1 + b1)
    deg1 = jnp.maximum(adj1.sum(axis=1, keepdims=True), 1.0)
    logits = (adj1 @ h1) / deg1 @ w2 + b2
    return jax.nn.log_softmax(logits, axis=1)


# ------------------------------------ main ------------------------------------

if __name__ == "__main__":
    in_channels = 16
    field_dim = 64          # hidden dim from the original script
    out_channels = 7
    N_total = 32

    key = jax.random.PRNGKey(0)
    kx, k1, k2 = jax.random.split(key, 3)
    rng = np.random.default_rng(0)

    x_all = jax.random.normal(kx, (N_total, in_channels), jnp.float32)

    # data_flow[0]: 24 sampled source nodes -> 12 target nodes
    n_id0, adj0 = make_block(rng, N_total, n_src=24, n_dst=12, avg_deg=4)
    # data_flow[1]: the 12 layer-1 outputs are the sources -> 4 final targets
    _, adj1 = make_block(rng, 12, n_src=12, n_dst=4, avg_deg=4)

    # conv1: SAGEConv(in_channels, field_dim); conv2: SAGEConv(field_dim, out)
    w1, b1 = init_sage_params(k1, in_channels, field_dim)
    w2, b2 = init_sage_params(k2, field_dim, out_channels)

    # host-side layout padding (sublane-aligned rows, lane-dense final output)
    adj0_p = pad_adj(adj0)                               # [16, 24]
    adj1_p = pad_adj(adj1, col_to=adj0_p.shape[0])       # [8, 16]
    w2_p, b2_p = pad_output_params(w2, b2)               # [64, 128], [1, 128]

    x0 = x_all[jnp.asarray(n_id0)]                       # x[data_flow[0].n_id]

    out = sage_net_forward(x0, adj0_p, w1, b1, adj1_p, w2_p, b2_p,
                           n_dst_final=4, out_channels=out_channels)
    out = jax.block_until_ready(out)

    assert out.shape == (4, out_channels)
    assert bool(jnp.all(jnp.isfinite(out)))
    # rows of log_softmax must exponentiate-sum to 1
    assert bool(jnp.allclose(jnp.sum(jnp.exp(out), axis=1), 1.0, atol=1e-4))

    # compare against the pure-JAX f32 reference (bf16 MXU + approx reciprocal
    # tolerances)
    ref = sage_net_reference(x0, jnp.asarray(adj0), w1, b1,
                             jnp.asarray(adj1), w2, b2)
    assert bool(jnp.allclose(out, ref, atol=5e-2, rtol=5e-2))

    print("KERNEL_OK")
</pallas_src>

<mosaic_0001>
module attributes {stable_mosaic.version = 11 : i64} {
  func.func @_sage_net_kernel(%arg0: memref<24x16xf32, #tpu.memory_space<vmem>>, %arg1: memref<16x24xf32, #tpu.memory_space<vmem>>, %arg2: memref<16x64xf32, #tpu.memory_space<vmem>>, %arg3: memref<1x64xf32, #tpu.memory_space<vmem>>, %arg4: memref<8x16xf32, #tpu.memory_space<vmem>>, %arg5: memref<64x128xf32, #tpu.memory_space<vmem>>, %arg6: memref<1x128xf32, #tpu.memory_space<vmem>>, %arg7: memref<8x128xf32, #tpu.memory_space<vmem>>) attributes {dimension_semantics = [], scalar_prefetch = 0 : i64, scratch_operands = 0 : i64, tpu.core_type = #tpu.core_type<tc>} {
    %c0 = arith.constant 0 : index
    %c0_0 = arith.constant 0 : index
    %0 = vector.load %arg1[%c0, %c0_0] : memref<16x24xf32, #tpu.memory_space<vmem>>, vector<16x24xf32>
    %c0_1 = arith.constant 0 : index
    %c0_2 = arith.constant 0 : index
    %1 = vector.load %arg0[%c0_1, %c0_2] : memref<24x16xf32, #tpu.memory_space<vmem>>, vector<24x16xf32>
    %2 = arith.truncf %0 : vector<16x24xf32> to vector<16x24xbf16>
    %3 = arith.truncf %1 : vector<24x16xf32> to vector<24x16xbf16>
    %cst = arith.constant dense<0.000000e+00> : vector<16x16xf32>
    %4 = tpu.matmul %2, %3, %cst {dimension_numbers = #tpu.dot_dimension_numbers<[1], [0], [0], [1], [0, 0, 1, 1], [], []>} : vector<16x24xbf16>, vector<24x16xbf16>, vector<16x16xf32> -> vector<16x16xf32>
    %cst_3 = arith.constant dense<0.000000e+00> : vector<16xf32>
    %5 = vector.multi_reduction <add>, %0, %cst_3 [1] : vector<16x24xf32> to vector<16xf32>
    %6 = vector.shape_cast %5 : vector<16xf32> to vector<16x1xf32>
    %cst_4 = arith.constant 1.000000e+00 : f32
    %7 = vector.broadcast %cst_4 : f32 to vector<16x1xf32>
    %8 = arith.maximumf %6, %7 : vector<16x1xf32>
    %9 = tpu.reciprocal %8 {approx = true} : vector<16x1xf32> -> vector<16x1xf32>
    %10 = vector.broadcast %9 : vector<16x1xf32> to vector<16x16xf32>
    %11 = arith.mulf %4, %10 : vector<16x16xf32>
    %12 = arith.truncf %11 : vector<16x16xf32> to vector<16x16xbf16>
    %c0_5 = arith.constant 0 : index
    %c0_6 = arith.constant 0 : index
    %13 = vector.load %arg2[%c0_5, %c0_6] : memref<16x64xf32, #tpu.memory_space<vmem>>, vector<16x64xf32>
    %14 = arith.truncf %13 : vector<16x64xf32> to vector<16x64xbf16>
    %cst_7 = arith.constant dense<0.000000e+00> : vector<16x64xf32>
    %15 = tpu.matmul %12, %14, %cst_7 {dimension_numbers = #tpu.dot_dimension_numbers<[1], [0], [0], [1], [0, 0, 1, 1], [], []>} : vector<16x16xbf16>, vector<16x64xbf16>, vector<16x64xf32> -> vector<16x64xf32>
    %c0_8 = arith.constant 0 : index
    %c0_9 = arith.constant 0 : index
    %16 = vector.load %arg3[%c0_8, %c0_9] : memref<1x64xf32, #tpu.memory_space<vmem>>, vector<1x64xf32>
    %17 = vector.broadcast %16 : vector<1x64xf32> to vector<16x64xf32>
    %18 = arith.addf %15, %17 : vector<16x64xf32>
    %cst_10 = arith.constant 0.000000e+00 : f32
    %19 = vector.broadcast %cst_10 : f32 to vector<16x64xf32>
    %20 = arith.maximumf %18, %19 : vector<16x64xf32>
    %c0_11 = arith.constant 0 : index
    %c0_12 = arith.constant 0 : index
    %21 = vector.load %arg4[%c0_11, %c0_12] : memref<8x16xf32, #tpu.memory_space<vmem>>, vector<8x16xf32>
    %22 = arith.truncf %21 : vector<8x16xf32> to vector<8x16xbf16>
    %23 = arith.truncf %20 : vector<16x64xf32> to vector<16x64xbf16>
    %cst_13 = arith.constant dense<0.000000e+00> : vector<8x64xf32>
    %24 = tpu.matmul %22, %23, %cst_13 {dimension_numbers = #tpu.dot_dimension_numbers<[1], [0], [0], [1], [0, 0, 1, 1], [], []>} : vector<8x16xbf16>, vector<16x64xbf16>, vector<8x64xf32> -> vector<8x64xf32>
    %cst_14 = arith.constant dense<0.000000e+00> : vector<8xf32>
    %25 = vector.multi_reduction <add>, %21, %cst_14 [1] : vector<8x16xf32> to vector<8xf32>
    %26 = vector.shape_cast %25 : vector<8xf32> to vector<8x1xf32>
    %cst_15 = arith.constant 1.000000e+00 : f32
    %27 = vector.broadcast %cst_15 : f32 to vector<8x1xf32>
    %28 = arith.maximumf %26, %27 : vector<8x1xf32>
    %29 = tpu.reciprocal %28 {approx = true} : vector<8x1xf32> -> vector<8x1xf32>
    %30 = vector.broadcast %29 : vector<8x1xf32> to vector<8x64xf32>
    %31 = arith.mulf %24, %30 : vector<8x64xf32>
    %32 = arith.truncf %31 : vector<8x64xf32> to vector<8x64xbf16>
    %c0_16 = arith.constant 0 : index
    %c0_17 = arith.constant 0 : index
    %33 = vector.load %arg5[%c0_16, %c0_17] : memref<64x128xf32, #tpu.memory_space<vmem>>, vector<64x128xf32>
    %34 = arith.truncf %33 : vector<64x128xf32> to vector<64x128xbf16>
    %cst_18 = arith.constant dense<0.000000e+00> : vector<8x128xf32>
    %35 = tpu.matmul %32, %34, %cst_18 {dimension_numbers = #tpu.dot_dimension_numbers<[1], [0], [0], [1], [0, 0, 1, 1], [], []>} : vector<8x64xbf16>, vector<64x128xbf16>, vector<8x128xf32> -> vector<8x128xf32>
    %c0_19 = arith.constant 0 : index
    %c0_20 = arith.constant 0 : index
    %36 = vector.load %arg6[%c0_19, %c0_20] : memref<1x128xf32, #tpu.memory_space<vmem>>, vector<1x128xf32>
    %37 = vector.broadcast %36 : vector<1x128xf32> to vector<8x128xf32>
    %38 = arith.addf %35, %37 : vector<8x128xf32>
    %cst_21 = arith.constant dense<0xFF800000> : vector<8xf32>
    %39 = vector.multi_reduction <maximumf>, %38, %cst_21 [1] : vector<8x128xf32> to vector<8xf32>
    %40 = vector.shape_cast %39 : vector<8xf32> to vector<8x1xf32>
    %41 = vector.broadcast %40 : vector<8x1xf32> to vector<8x128xf32>
    %42 = arith.subf %38, %41 : vector<8x128xf32>
    %43 = math.exp %42 : vector<8x128xf32>
    %cst_22 = arith.constant dense<0.000000e+00> : vector<8xf32>
    %44 = vector.multi_reduction <add>, %43, %cst_22 [1] : vector<8x128xf32> to vector<8xf32>
    %45 = vector.shape_cast %44 : vector<8xf32> to vector<8x1xf32>
    %46 = math.log %45 : vector<8x1xf32>
    %47 = vector.broadcast %46 : vector<8x1xf32> to vector<8x128xf32>
    %48 = arith.subf %42, %47 : vector<8x128xf32>
    %c0_23 = arith.constant 0 : index
    %c0_24 = arith.constant 0 : index
    %49 = vector.load %arg7[%c0_23, %c0_24] : memref<8x128xf32, #tpu.memory_space<vmem>>, vector<8x128xf32>
    tpu.vector_store %arg7[%c0_23, %c0_24], %48 {strides = array<i32>} : memref<8x128xf32, #tpu.memory_space<vmem>>, vector<8x128xf32>,
    return
  }
}

</mosaic_0001>

<bundles_post_ra>
// kernel: tpu_custom_call.1
= control target key start
LH: loop header
LB: loop body
LE: loop exit
PB: predicated region body
PF: predicated region fallthrough
CT: control target
= control target key end

     0   :  { %12 = vsyncpa [#allocation3], 0  ;;  %s522_s0 = inlined_call_operand.vmem [shape: f32[24,16], index: 0, kind: input, shape index: {}]   ;;  %s523_s1 = inlined_call_operand.vmem [shape: f32[16,24], index: 1, kind: input, shape index: {}]   ;;  %s524_s2 = inlined_call_operand.vmem [shape: f32[16,64], index: 2, kind: input, shape index: {}]   ;;  %s525_s3 = inlined_call_operand.vmem [shape: f32[1,64], index: 3, kind: input, shape index: {}]   ;;  %s526_s4 = inlined_call_operand.vmem [shape: f32[8,16], index: 4, kind: input, shape index: {}]   ;;  %s527_s5 = inlined_call_operand.hbm [shape: f32[64,128], index: 5, kind: input, shape index: {}]   ;;  %s528_s6 = inlined_call_operand.vmem [shape: f32[1,128], index: 6, kind: input, shape index: {}]   ;;  %s529_s7 = inlined_call_operand.hbm [shape: f32[8,128], index: 7, kind: output, shape index: {}]  }
   0x1   :  { %13 = vsyncpa [#allocation4], 0  ;;  %s421_s24 = smov [#allocation2]  }
   0x2   :  { %s29_s25 = sshll.u32 %s421_s24, 4  ;;  %s30_s25 = int_to_ptr.vmem [resolvable:$true] %s29_s25 }
   0x3   :  { %s385_s26 = scalar_lea.vmem %s30_s25, 1024  ;;  %p390_p1 = scmp.lt.s32.totalorder %s30_s25, %s30_s25 }
   0x4   :  { %p386_p0 = scmp.ne.s32.totalorder %s30_s25, %s385_s26  ;;  %p391_p2 = scmp.lt.s32.totalorder %s385_s26, %s385_s26 }
   0x6   :  { %p392_p3 = por %p391_p2, %p390_p1 }
   0x8   :  { %p393_p4 = pnand %p392_p3, %p386_p0 }
   0xa   :  { %396 = shalt.err (!%p393_p4)
}
   0xb   :  { %s422_s27 = smov 128   ;;  %s423_s28 = smov 8  }
   0xc   :  { %35 = dma.hbm_to_vmem [thread:$0]  %s527_s5, 1024, %s30_s25, [#allocation3], %s422_s27, %s422_s27, %s423_s28  }
   0xd   :  { %417 = dma.done.wait [#allocation3], 1024  }
   0xe   :  { %418 = vsyncadd [#allocation3], 4294966272  ;;  %v424_v0 = vmov 0.0   ;;  %vm425_vm0 = vmmov 0   ;;  %v46_v1 = vld [vmem:[%s522_s0 + $0x10] sm:$0xff]  ;;  %vm54_vm1 = vcmask 1043456  }
   0xf   :  { %329 = vmatprep.subr.bf16.mxu0 %v424_v0  ;;  %333 = vmatprep.mubr.msk.bf16.mxu0 %vm425_vm0, %v424_v0  ;;  %v49_v2 = vpack.c.bf16 %v46_v1, %v46_v1  ;;  %v44_v3 = vld [vmem:[%s522_s0] sm:$0xff]  ;;  %v45_v4 = vld [vmem:[%s522_s0 + $0x8] sm:$0xff]  ;;  %vm50_vm2 = vcmask 195584   ;;  %vm122_vm3 = vcmask 130048   ;;  %v228_v30 = vld [vmem:[#allocation2 + $0x30] sm:$0xff]  ;;  %vm241_vm4 = vcmask 523264  }
  0x10   :  { %337 = vmatprep.subr.bf16.mxu1 %v424_v0  ;;  %339 = vmatprep.mubr.msk.bf16.mxu1 %vm425_vm0, %v424_v0  ;;  %v42_v5 = vld [vmem:[%s523_s1] sm:$0xff]  ;;  %v43_v8 = vld [vmem:[%s523_s1 + $0x8] sm:$0xff]  ;;  %v48_v9 = vpack.c.bf16 %v45_v4, %v44_v3  ;;  %v229_v31 = vld [vmem:[#allocation2 + $0x38] sm:$0xff]  ;;  %s426_s22 = smov [#allocation5]  }
  0x11   :  { %v99_v6 = vsel %vm50_vm2, %v42_v5, 0.0  ;;  %v56_v7 = vsel %vm54_vm1, %v49_v2, 0  ;;  %v102_v10 = vsel %vm50_vm2, %v43_v8, 0.0  ;;  %v47_v11 = vpack.c.bf16 %v43_v8, %v42_v5  ;;  %v112_v12 = vld [vmem:[%s524_s2] sm:$0xff]  ;;  %v113_v13 = vld [vmem:[%s524_s2 + $0x8] sm:$0xff]  ;;  %v224_v36 = vld [vmem:[#allocation2 + $0x10] sm:$0xff] }
  0x12   :  { %100 = vadd.xlane.f32.xlu0 %v99_v6  ;;  %330 = vmatpush3.bf16.msra.mxu0 %v56_v7  ;;  %v114_v14 = vpack.c.bf16 %v113_v13, %v112_v12  ;;  %v169_v28 = vld [vmem:[%s526_s4] sm:$0xff]  ;;  %v233_v33 = vpack.c.bf16 %v229_v31, %v228_v30  ;;  %v227_v34 = vld [vmem:[#allocation2 + $0x28] sm:$0xff]  ;;  %v225_v37 = vld [vmem:[#allocation2 + $0x18] sm:$0xff]  ;;  %s302_s23 = sshll.u32 %s426_s22, 4  ;;  %s303_s23 = int_to_ptr.vmem [resolvable:$true] %s302_s23 }
  0x13   :  { %331 = vmatprep.subr.bf16.mxu0 %v424_v0  ;;  %v215_v29 = vsel %vm122_vm3, %v169_v28, 0.0  ;;  %v226_v32 = vld [vmem:[#allocation2 + $0x20] sm:$0xff]  ;;  %v231_v38 = vpack.c.bf16 %v225_v37, %v224_v36  ;;  %v170_v49 = vpack.c.bf16 %v169_v28, %v169_v28  ;;  %v223_v51 = vld [vmem:[#allocation2 + $0x8] sm:$0xff]  ;;  %p402_p6 = scmp.lt.s32.totalorder %s303_s23, %s303_s23 }
  0x14   :  { %338 = vmatpush3.bf16.msra.mxu1 %v114_v14  ;;  %216 = vadd.xlane.f32.xlu1 %v215_v29  ;;  %v232_v35 = vpack.c.bf16 %v227_v34, %v226_v32  ;;  %v312_v39 = vld [vmem:[%s525_s3] ss:$0 sm:$0xff] }
  0x15   :  { %343 = vmatprep.subr.bf16.mxu1 %v424_v0  ;;  %v222_v50 = vld [vmem:[#allocation2] sm:$0xff] }
  0x16   :  { %103 = vadd.xlane.f32.xlu0 %v102_v10  ;;  %332 = vmatpush3.bf16.msra.mxu0 %v48_v9  ;;  %v230_v52 = vpack.c.bf16 %v223_v51, %v222_v50  ;;  %v315_v62 = vld [vmem:[%s528_s6] ss:$0 sm:$0xff]  ;;  %s397_s6 = scalar_lea.vmem %s303_s23, 128 }
  0x17   :  { %349 = vmatprep.subr.bf16.mxu0 %v424_v0  ;;  %p398_p5 = scmp.ne.s32.totalorder %s303_s23, %s397_s6  ;;  %p403_p7 = scmp.lt.s32.totalorder %s397_s6, %s397_s6 }
  0x19   :  { %334 = vmatmul.mubr.msk.bf16.vlgmr.msra.gmra.mxu0 %vm50_vm2, %v47_v11  ;;  %p404_p8 = por %p403_p7, %p402_p6 }
  0x1a   :  { %357 = vmatprep.mubr.msk.bf16.mxu0 %vm425_vm0, %v424_v0  ;;  %350 = vmatpush3.bf16.msra.mxu0 %v233_v33 }
  0x1b   :  { %351 = vmatprep.subr.bf16.mxu0 %v424_v0  ;;  %p405_p9 = pnand %p404_p8, %p398_p5 }
  0x1e   :  { %352 = vmatpush3.bf16.msra.mxu0 %v232_v35 }
  0x1f   :  { %353 = vmatprep.subr.bf16.mxu0 %v424_v0 }
  0x22   :  { %354 = vmatpush3.bf16.msra.mxu0 %v231_v38 }
  0x23   :  { %355 = vmatprep.subr.bf16.mxu0 %v424_v0 }
  0x26   :  { %356 = vmatpush3.bf16.msra.mxu0 %v230_v52 }
  0x9b   :  { %v101_v15 = vpop.xlane.xlu0 %100 }
  0x9c   :  { %v105_v17 = vmax.f32 %v101_v15, 1.0 }
  0x9d   :  { %v217_v53 = vpop.xlane.xlu1 %216 }
  0x9e   :  { %367 = vrcp.f32 %v105_v17  ;;  %v218_v54 = vmax.f32 %v217_v53, 1.0 }
  0x9f   :  { %v104_v16 = vpop.xlane.xlu0 %103 }
  0xa0   :  { %v106_v18 = vmax.f32 %v104_v16, 1.0 }
  0xa2   :  { %369 = vrcp.f32 %v106_v18 }
  0xa3   :  { %371 = vrcp.f32 %v218_v54 }
  0xab   :  { %v368_v20 = vpop.eup %367 }
  0xaf   :  { %v370_v21 = vpop.eup %369 }
  0xb0   :  { %v372_v55 = vpop.eup %371 }
  0xd9   :  { %v92_v19 = vpop.f32.mrf.mxu0 }
  0xda   :  { %v109_v24 = vmul.f32 %v368_v20, %v92_v19 }
  0xdb   :  { %v335_v22 = vpop.f32.mrf.mxu0 }
  0xdd   :  { %v95_v23 = vpop.f32.mrf.mxu0 }
  0xde   :  { %v110_v25 = vmul.f32 %v370_v21, %v95_v23 }
  0xdf   :  { %v336_v26 = vpop.f32.mrf.mxu0 }
  0xe0   :  { %v111_v27 = vpack.c.bf16 %v110_v25, %v109_v24 }
  0xe2   :  { %340 = vmatmul.mubr.msk.bf16.vlgmr.msra.gmra.mxu1 %vm122_vm3, %v111_v27 }
  0xe3   :  { %345 = vmatprep.mubr.msk.bf16.mxu1 %vm425_vm0, %v424_v0 }
 0x1a2   :  { %v160_v40 = vpop.f32.mrf.mxu1 }
 0x1a3   :  { %v161_v42 = vadd.f32 %v312_v39, %v160_v40 }
 0x1a4   :  { %v341_v41 = vpop.f32.mrf.mxu1 }
 0x1a5   :  { %v167_v46 = vmax.f32 %v161_v42, 0.0 }
 0x1a6   :  { %v163_v43 = vpop.f32.mrf.mxu1 }
 0x1a7   :  { %v164_v44 = vadd.f32 %v312_v39, %v163_v43 }
 0x1a8   :  { %v342_v45 = vpop.f32.mrf.mxu1 }
 0x1a9   :  { %v168_v47 = vmax.f32 %v164_v44, 0.0 }
 0x1ab   :  { %v171_v48 = vpack.c.bf16 %v168_v47, %v167_v46 }
 0x1ad   :  { %344 = vmatpush3.bf16.msra.mxu1 %v171_v48 }
 0x1b0   :  { %346 = vmatmul.mubr.msk.bf16.vlgmr.msra.gmra.mxu1 %vm122_vm3, %v170_v49 }
 0x270   :  { %v209_v56 = vpop.f32.mrf.mxu1 }
 0x271   :  { %v220_v57 = vmul.f32 %v372_v55, %v209_v56 }
 0x272   :  { %v347_v58 = vpop.f32.mrf.mxu1 }
 0x273   :  { %v221_v59 = vpack.c.bf16 %v220_v57, %v220_v57 }
 0x274   :  { %v212_v60 = vpop.f32.mrf.mxu1 }
 0x275   :  { %358 = vmatmul.mubr.msk.bf16.vlgmr.msra.gmra.mxu0 %vm241_vm4, %v221_v59 }
 0x276   :  { %v348_v61 = vpop.f32.mrf.mxu1 }
 0x335   :  { %v279_v63 = vpop.f32.mrf.mxu0 }
 0x336   :  { %v280_v0 = vadd.f32 %v315_v62, %v279_v63 }
 0x337   :  { %v359_v1 = vpop.f32.mrf.mxu0 }
 0x338   :  { %285 = vmax.xlane.f32.xlu1 %v280_v0 }
 0x339   :  { %v282_v2 = vpop.f32.mrf.mxu0 }
 0x33b   :  { %v360_v3 = vpop.f32.mrf.mxu0 }
 0x3c1   :  { %v286_v4 = vpop.xlane.xlu1 %285 }
 0x3c2   :  { %v287_v5 = vsub.f32 %v280_v0, %v286_v4 }
 0x3c4   :  { %v288_v6 = vmul.f32 1.442695, %v287_v5 }
 0x3c6   :  { %373 = vpow2.f32 %v288_v6 }
 0x3d3   :  { %v374_v7 = vpop.eup %373 }
 0x3d4   :  { %290 = vadd.xlane.f32.xlu0 %v374_v7 }
 0x45d   :  { %v291_v8 = vpop.xlane.xlu0 %290 }
 0x45e   :  { %375 = vlog2.f32 %v291_v8 }
 0x46b   :  { %v376_v9 = vpop.eup %375 }
 0x46c   :  { %v293_v10 = vmul.f32 0.6931472, %v376_v9 }
 0x46e   :  { %v294_v11 = vsub.f32 %v287_v5, %v293_v10 }
 0x470   :  { %295 = vst [vmem:[#allocation5] sm:$0xff] %v294_v11 }
 0x471   :  { %408 = shalt.err (!%p405_p9)
}
 0x472   :  { %305 = dma.vmem_to_hbm [thread:$0]  %s303_s23, 128, %s529_s7, [#allocation4]  }
 0x473   :  { %419 = dma.done.wait [#allocation4], 128  }
 0x474   :  { %420 = vsyncadd [#allocation4], 4294967168 }
 0x475   :  { %309 = vsyncpa [#allocation3], 1 }
 0x476   :  { %310 = vsyncpa [#allocation4], 1 }

</bundles_post_ra>
